<compile_context>
chip_gen: v5e
topology: v5e:2x2
jax: 0.10.0
libtpu: 0.0.40
codegen_flags: <defaults>
</compile_context>

<pallas_src>
import jax
import jax.numpy as jnp
from jax.experimental import pallas as pl
from jax.experimental.pallas import tpu as pltpu


def _h_sigmoid_kernel(x_ref, o_ref):
    x = x_ref[...]
    # h_sigmoid(x) = relu6(x + 3) / 6, computed in f32 regardless of stream dtype.
    y = jnp.clip(x.astype(jnp.float32) + 3.0, 0.0, 6.0) * (1.0 / 6.0)
    o_ref[...] = y.astype(o_ref.dtype)


def _round_up(a, b):
    return ((a + b - 1) // b) * b


def _choose_cols(n, sub):
    """Pick a lane-dense width (multiple of 128). Returns (cols, needs_pad)."""
    # Fast path: widest width that divides n exactly AND yields >= sub full
    # sublane rows -> plain reshape, no padding.
    for cols in (1024, 512, 256, 128):
        if n % cols == 0 and n >= sub * cols:
            return cols, False
    # Tiny inputs: any width that divides n (narrowest first -> more rows).
    for cols in (128, 256, 512, 1024):
        if n % cols == 0:
            return cols, False
    # Ragged size: narrowest lane width keeps the pad < 128 elements.
    return 128, True


def h_sigmoid(x, *, block_bytes=4 * 1024 * 1024):
    """Elementwise relu6(x + 3) / 6 for any shape / float dtype."""
    orig_shape = x.shape
    n = int(x.size)
    itemsize = jnp.dtype(x.dtype).itemsize
    sub = max(8, 32 // itemsize)  # sublane packing: 8 f32, 16 bf16/f16, 32 int8

    cols, needs_pad = _choose_cols(n, sub)
    rows = pl.cdiv(n, cols)

    if needs_pad:
        # TODO(synk): fuse this pad into the pallas_call (allow_input_fusion)
        # to remove the extra HBM pass on ragged (non multiple-of-128) sizes.
        flat = jnp.pad(x.reshape(-1), (0, rows * cols - n))
        x2 = flat.reshape(rows, cols)
    else:
        x2 = x.reshape(rows, cols)  # free: contiguous reshape, no copy

    # ~block_bytes per block, sublane-aligned, dtype-aware.
    target_rows = max(sub, (block_bytes // (cols * itemsize)) // sub * sub)
    if _round_up(rows, sub) <= target_rows:
        block_rows = rows           # single block == full row extent (always legal)
    else:
        block_rows = target_rows    # multiple of `sub`; last block edge-masked

    grid = (pl.cdiv(rows, block_rows),)
    out2 = pl.pallas_call(
        _h_sigmoid_kernel,
        out_shape=jax.ShapeDtypeStruct((rows, cols), x.dtype),
        grid_spec=pltpu.PrefetchScalarGridSpec(
            num_scalar_prefetch=0,
            grid=grid,
            in_specs=[pl.BlockSpec((block_rows, cols), lambda i: (i, 0))],
            out_specs=pl.BlockSpec((block_rows, cols), lambda i: (i, 0)),
        ),
        compiler_params=pltpu.CompilerParams(
            dimension_semantics=("parallel",),
            # 2 in + 2 out buffers of a 4 MiB block ~= 16 MiB pipeline; 32 MiB
            # scoped VMEM is safe on every generation (v5e default is 16 MiB).
            vmem_limit_bytes=32 * 1024 * 1024,
        ),
    )(x2)

    if needs_pad:
        return out2.reshape(-1)[:n].reshape(orig_shape)
    return out2.reshape(orig_shape)


def h_sigmoid_ref(x):
    """Pure-JAX reference mirroring the PyTorch forward."""
    return jnp.clip(x.astype(jnp.float32) + 3.0, 0.0, 6.0) / 6.0


if __name__ == "__main__":
    key = jax.random.PRNGKey(0)
    k1, k2, k3 = jax.random.split(key, 3)

    # Primary case: NCHW activation, f32, size divisible by 128 (fast path,
    # no pad / slice). Scale so both clip boundaries (-3, +3) are exercised.
    x = jax.random.normal(k1, (2, 4, 16, 16), dtype=jnp.float32) * 4.0
    out = jax.block_until_ready(h_sigmoid(x))
    ref = h_sigmoid_ref(x)
    assert out.shape == x.shape
    assert jnp.allclose(out, ref, atol=1e-6, rtol=1e-6), "f32 mismatch vs reference"

    # bf16 streaming path (halved HBM traffic, 16-row sublane packing).
    xb = (jax.random.normal(k2, (2, 8, 16, 32), dtype=jnp.float32) * 4.0).astype(jnp.bfloat16)
    outb = jax.block_until_ready(h_sigmoid(xb))
    refb = h_sigmoid_ref(xb).astype(jnp.bfloat16)
    assert outb.shape == xb.shape
    assert jnp.allclose(outb.astype(jnp.float32), refb.astype(jnp.float32),
                        atol=1e-2, rtol=1e-2), "bf16 mismatch vs reference"

    # Ragged size (not a multiple of 128) exercises the pad/slice fallback.
    xr = jax.random.normal(k3, (3, 5, 7), dtype=jnp.float32) * 4.0
    outr = jax.block_until_ready(h_sigmoid(xr))
    refr = h_sigmoid_ref(xr)
    assert outr.shape == xr.shape
    assert jnp.allclose(outr, refr, atol=1e-6, rtol=1e-6), "ragged mismatch vs reference"

    print("KERNEL_OK")
</pallas_src>

<mosaic_0001>
module attributes {stable_mosaic.version = 11 : i64} {
  func.func @_h_sigmoid_kernel(%arg0: i32, %arg1: memref<8x256xf32, #tpu.memory_space<vmem>>, %arg2: memref<8x256xf32, #tpu.memory_space<vmem>>) attributes {dimension_semantics = [#tpu.dimension_semantics<parallel>], iteration_bounds = array<i64: 1>, scalar_prefetch = 0 : i64, scratch_operands = 0 : i64, tpu.core_type = #tpu.core_type<tc>, window_params = [{transform_indices = @transform_0, window_bounds = array<i64: 8, 256>}, {transform_indices = @transform_1, window_bounds = array<i64: 8, 256>}]} {
    %c0 = arith.constant 0 : index
    %c0_0 = arith.constant 0 : index
    %0 = vector.load %arg1[%c0, %c0_0] : memref<8x256xf32, #tpu.memory_space<vmem>>, vector<8x256xf32>
    %cst = arith.constant 3.000000e+00 : f32
    %1 = vector.broadcast %cst : f32 to vector<8x256xf32>
    %2 = arith.addf %0, %1 : vector<8x256xf32>
    %cst_1 = arith.constant 0.000000e+00 : f32
    %cst_2 = arith.constant 6.000000e+00 : f32
    %3 = vector.broadcast %cst_1 : f32 to vector<8x256xf32>
    %4 = arith.maximumf %3, %2 : vector<8x256xf32>
    %5 = vector.broadcast %cst_2 : f32 to vector<8x256xf32>
    %6 = arith.minimumf %5, %4 : vector<8x256xf32>
    %cst_3 = arith.constant 0.166666672 : f32
    %7 = vector.broadcast %cst_3 : f32 to vector<8x256xf32>
    %8 = arith.mulf %6, %7 : vector<8x256xf32>
    %c0_4 = arith.constant 0 : index
    %c0_5 = arith.constant 0 : index
    %9 = vector.load %arg2[%c0_4, %c0_5] : memref<8x256xf32, #tpu.memory_space<vmem>>, vector<8x256xf32>
    tpu.vector_store %arg2[%c0_4, %c0_5], %8 {strides = array<i32>} : memref<8x256xf32, #tpu.memory_space<vmem>>, vector<8x256xf32>,
    return
  }
  func.func @transform_0(%arg0: i32) -> (i32, i32) {
    %c0_i32 = arith.constant 0 : i32
    %c0_i32_0 = arith.constant 0 : i32
    return %arg0, %c0_i32 : i32, i32
  }
  func.func @transform_1(%arg0: i32) -> (i32, i32) {
    %c0_i32 = arith.constant 0 : i32
    %c0_i32_0 = arith.constant 0 : i32
    return %arg0, %c0_i32 : i32, i32
  }
}

</mosaic_0001>

<bundles_post_ra>
// kernel: tpu_custom_call.1
= control target key start
LH: loop header
LB: loop body
LE: loop exit
PB: predicated region body
PF: predicated region fallthrough
CT: control target
= control target key end

     0   :  { %6 = vsyncpa [#allocation3], 0  ;;  %s124_s0 = inlined_call_operand.hbm [shape: f32[8,256], index: 0, kind: input, shape index: {}]   ;;  %s125_s1 = inlined_call_operand.hbm [shape: f32[8,256], index: 1, kind: output, shape index: {}]  }
   0x1   :  { %7 = vsyncpa [#allocation4], 0  ;;  %s13_s8 = sshll.u32 %s124_s0, 4  ;;  %s106_s9 = smov [#allocation2]   ;;  %s14_s8 = int_to_ptr.hbm [resolvable:$true] %s13_s8 }
   0x2   :  { %s15_s10 = sshll.u32 %s106_s9, 4  ;;  %s16_s10 = int_to_ptr.vmem [resolvable:$true] %s15_s10 }
   0x3   :  { %18 = dma.hbm_to_vmem [thread:$0]  %s14_s8, 256, %s16_s10, [#allocation3]  }
   0x4   :  { %102 = dma.done.wait [#allocation3], 256  }
   0x5   :  { %103 = vsyncadd [#allocation3], 4294967040  ;;  %v23_v0 = vld [vmem:[#allocation2] sm:$0xff]  ;;  %v24_v1 = vld [vmem:[#allocation2 + $0x8] sm:$0xff]  ;;  %s107_s11 = smov [#allocation5]   ;;  %s42_s0 = sshll.u32 %s125_s1, 4  ;;  %s43_s0 = int_to_ptr.hbm [resolvable:$true] %s42_s0 }
   0x6   :  { %v25_v2 = vadd.f32 3.0, %v23_v0  ;;  %v26_v3 = vadd.f32 3.0, %v24_v1  ;;  %s40_s12 = sshll.u32 %s107_s11, 4  ;;  %s41_s12 = int_to_ptr.vmem [resolvable:$true] %s40_s12 }
   0x8   :  { %v27_v4 = vmax.f32 %v25_v2, 0.0  ;;  %v28_v5 = vmax.f32 %v26_v3, 0.0 }
   0xa   :  { %v29_v6 = vmin.f32 %v27_v4, 6.0  ;;  %v30_v7 = vmin.f32 %v28_v5, 6.0 }
   0xc   :  { %v31_v8 = vmul.f32 0.16666667, %v29_v6  ;;  %v32_v9 = vmul.f32 0.16666667, %v30_v7 }
   0xe   :  { %33 = vst [vmem:[#allocation5] sm:$0xff] %v31_v8 }
   0xf   :  { %34 = vst [vmem:[#allocation5 + $0x8] sm:$0xff] %v32_v9 }
  0x10   :  { %45 = dma.vmem_to_hbm [thread:$0]  %s41_s12, 256, %s43_s0, [#allocation4]  }
  0x11   :  { %104 = dma.done.wait [#allocation4], 256  }
  0x12   :  { %105 = vsyncadd [#allocation4], 4294967040 }
  0x13   :  { %50 = vsyncpa [#allocation3], 1 }
  0x14   :  { %51 = vsyncpa [#allocation4], 1 }

</bundles_post_ra>
